<compile_context>
chip_gen: v5e
topology: v5e:2x2
jax: 0.10.0
libtpu: 0.0.40
codegen_flags: <defaults>
</compile_context>

<pallas_src>
import jax
import jax.numpy as jnp
from jax.experimental import pallas as pl
from jax.experimental.pallas import tpu as pltpu

PART = 6
BN_EPS = 1e-5
LANE = 128
VMEM_BUDGET = 36 << 20      # target live VMEM for tile selection
VMEM_LIMIT = 48 << 20       # scoped VMEM limit (safe on v5e/v6e/v7x)


def _pcb_part_kernel(x_ref, w1_ref, b1_ref, w2_ref, b2_ref, out_ref):
    """One grid step == (part p, batch tile b).

    x_ref  : (TB, hp, W, C)  bf16 feature rows owned by part p, batch tile b
    w1_ref : (C, NB)         bf16 BN-folded bottleneck weight (incl. 1/(hp*W))
    b1_ref : (1, NB)         f32  BN-folded bottleneck bias
    w2_ref : (NB, NCP)       bf16 classifier weight (classes padded to 128)
    b2_ref : (1, NCP)        f32  classifier bias
    out_ref: (TB, NCP)       f32  logits for (part p, batch tile b)
    """
    x = x_ref[...]                                                # bf16
    tb = x.shape[0]
    c = x.shape[-1]

    # AdaptiveAvgPool2d((PART, 1)): this block holds exactly the hp rows of
    # part p, so the adaptive pool is a plain mean; the 1/(hp*W) scale is
    # folded into w1, so only a spatial SUM (f32 accumulation) is needed.
    # Merge (hp, W) into one contiguous axis -> single-axis reduction.
    s = jnp.sum(x.reshape(tb, -1, c).astype(jnp.float32), axis=1)  # (TB, C)

    # Dropout(p=0.5) on pooled features: identity in eval mode.

    # ClassBlock.add_block: Linear(C -> NB) with BatchNorm1d folded in (eval).
    h = jnp.dot(s.astype(jnp.bfloat16), w1_ref[...],
                preferred_element_type=jnp.float32)
    h = h + b1_ref[...]                                           # (TB, NB) f32

    # Dropout(p=0.5) inside ClassBlock: identity in eval mode.

    # ClassBlock.classifier: Linear(NB -> class_num), bf16 MXU / f32 accum.
    logits = jnp.dot(h.astype(jnp.bfloat16), w2_ref[...],
                     preferred_element_type=jnp.float32)
    logits = logits + b2_ref[...]                                 # (TB, NCP)

    out_ref[...] = logits.astype(out_ref.dtype)


def _round_up(x, m):
    return (x + m - 1) // m * m


def _pick_batch_tile(B, hp, W, C, NB, NC_pad):
    """Largest batch tile whose double-buffered VMEM footprint fits budget."""
    per_row = hp * W * C * 2                                      # bf16 feature row
    weight_bytes = 2 * (C * NB * 2 + NB * 4 + NB * NC_pad * 2 + NC_pad * 4)
    b_cap = _round_up(B, 8)
    for tb in (128, 64, 32, 16, 8):
        feat = 2 * tb * per_row                                   # double-buffered
        out = 2 * tb * NC_pad * 4
        if feat + weight_bytes + out <= VMEM_BUDGET:
            return min(tb, b_cap)
    return min(8, b_cap)


def pcb_head(feat_nhwc, params, *, batch_tile=None):
    """feat_nhwc: (B, H, W, C) layer4 feature map, H divisible by PART.

    Returns a list of PART arrays, each (B, num_classes) — same structure as
    the PyTorch module's `y`.
    """
    B, H, W, C = feat_nhwc.shape
    assert H % PART == 0, "H must be divisible by the number of parts"
    hp = H // PART

    # ---- fold eval-mode BatchNorm1d + 1/(hp*W) pooling scale into w1/b1 ----
    scale = params["gamma"] * jax.lax.rsqrt(params["rvar"] + BN_EPS)  # (P,1,NB)
    w1 = params["w1"] * scale / float(hp * W)                         # (P,C,NB)
    b1 = (params["b1"] - params["rmean"]) * scale + params["beta"]    # (P,1,NB)
    w2 = params["w2"]
    b2 = params["b2"]
    NB = w1.shape[-1]
    NUM_CLASSES = w2.shape[-1]

    # ---- lane-dense class dim ----
    NC_pad = _round_up(NUM_CLASSES, LANE)
    if NC_pad != NUM_CLASSES:
        w2 = jnp.pad(w2, ((0, 0), (0, 0), (0, NC_pad - NUM_CLASSES)))
        b2 = jnp.pad(b2, ((0, 0), (0, 0), (0, NC_pad - NUM_CLASSES)))

    # ---- batch tiling: large tile (MXU M occupancy) bounded by VMEM ----
    TB = batch_tile if batch_tile is not None else _pick_batch_tile(
        B, hp, W, C, NB, NC_pad)
    B_pad = _round_up(B, TB)

    feat = feat_nhwc
    if B_pad != B:
        feat = jnp.pad(feat, ((0, B_pad - B), (0, 0), (0, 0), (0, 0)))

    # ---- bf16 streaming for the HBM-bound feature read + both matmuls ----
    # (a real backbone should emit bf16 directly; cast here only because the
    #  feature map arrives as a plain f32 array in this standalone script)
    feat = feat.astype(jnp.bfloat16)
    w1 = w1.astype(jnp.bfloat16)
    b1 = b1.astype(jnp.float32)
    w2 = w2.astype(jnp.bfloat16)
    b2 = b2.astype(jnp.float32)

    nb = B_pad // TB

    out = pl.pallas_call(
        _pcb_part_kernel,
        out_shape=jax.ShapeDtypeStruct((PART, B_pad, NC_pad), jnp.float32),
        grid_spec=pltpu.PrefetchScalarGridSpec(
            num_scalar_prefetch=0,
            grid=(PART, nb),
            in_specs=[
                # feature rows belonging to (part p, batch tile b)
                pl.BlockSpec((TB, hp, W, C), lambda p, b: (b, p, 0, 0)),
                # weights/biases: same block for every batch tile -> VMEM-resident
                pl.BlockSpec((None, C, NB), lambda p, b: (p, 0, 0)),       # w1'
                pl.BlockSpec((None, 1, NB), lambda p, b: (p, 0, 0)),       # b1'
                pl.BlockSpec((None, NB, NC_pad), lambda p, b: (p, 0, 0)),  # w2
                pl.BlockSpec((None, 1, NC_pad), lambda p, b: (p, 0, 0)),   # b2
            ],
            out_specs=pl.BlockSpec((None, TB, NC_pad), lambda p, b: (p, b, 0)),
        ),
        compiler_params=pltpu.CompilerParams(
            dimension_semantics=("parallel", "parallel"),
            vmem_limit_bytes=VMEM_LIMIT),
    )(feat, w1, b1, w2, b2)

    return [out[i, :B, :NUM_CLASSES] for i in range(PART)]


def init_params(key, in_dim, num_bottleneck, class_num):
    """Deterministic init mirroring weights_init_kaiming / _classifier."""
    keys = jax.random.split(key, 4)
    # Linear(in_dim, num_bottleneck): kaiming_normal_, mode='fan_out', a=0
    #   std = sqrt(2 / fan_out) = sqrt(2 / num_bottleneck); bias = 0
    w1 = (jax.random.normal(keys[0], (PART, in_dim, num_bottleneck), jnp.float32)
          * jnp.sqrt(2.0 / num_bottleneck))
    b1 = jnp.zeros((PART, 1, num_bottleneck), jnp.float32)
    # BatchNorm1d: weight ~ N(1, 0.02), bias = 0, running stats (eval) 0 / 1
    gamma = 1.0 + 0.02 * jax.random.normal(
        keys[1], (PART, 1, num_bottleneck), jnp.float32)
    beta = jnp.zeros((PART, 1, num_bottleneck), jnp.float32)
    rmean = jnp.zeros((PART, 1, num_bottleneck), jnp.float32)
    rvar = jnp.ones((PART, 1, num_bottleneck), jnp.float32)
    # classifier Linear(num_bottleneck, class_num): std = 0.001, bias = 0
    w2 = 0.001 * jax.random.normal(
        keys[2], (PART, num_bottleneck, class_num), jnp.float32)
    b2 = jnp.zeros((PART, 1, class_num), jnp.float32)
    return dict(w1=w1, b1=b1, gamma=gamma, beta=beta,
                rmean=rmean, rvar=rvar, w2=w2, b2=b2)


def reference_jax(feat_nhwc, params):
    """Pure-jnp f32 reference of the same head (PyTorch eval semantics)."""
    B, H, W, C = feat_nhwc.shape
    hp = H // PART
    outs = []
    for i in range(PART):
        f = jnp.mean(feat_nhwc[:, i * hp:(i + 1) * hp], axis=(1, 2))
        h = f @ params["w1"][i] + params["b1"][i]
        h = ((h - params["rmean"][i])
             / jnp.sqrt(params["rvar"][i] + BN_EPS)
             * params["gamma"][i] + params["beta"][i])
        outs.append(h @ params["w2"][i] + params["b2"][i])
    return outs


def _check(feat_nhwc, params, num_classes):
    y = pcb_head(feat_nhwc, params)
    y = [jax.block_until_ready(t) for t in y]
    y_ref = reference_jax(feat_nhwc, params)
    B = feat_nhwc.shape[0]
    for a, b in zip(y, y_ref):
        assert a.shape == (B, num_classes)
        # bf16 feature/weight streaming -> compare to f32 reference loosely.
        assert jnp.allclose(a, b, atol=2e-3, rtol=5e-2)


if __name__ == "__main__":
    # Small stand-in shapes: C=32 (for 2048), H=12, W=4 (layer4 feature map
    # with stride hacks), bottleneck=32 (for 256), class_num=8.
    key = jax.random.PRNGKey(0)
    k_feat1, k_feat2, k_par = jax.random.split(key, 3)

    C, H, W = 32, 12, 4
    NB, NUM_CLASSES = 32, 8
    params = init_params(k_par, C, NB, NUM_CLASSES)

    # PyTorch backbone output would be NCHW; convert to the kernel's NHWC layout.
    # Case 1: tiny batch (B=4) -> TB=8 path with batch padding.
    feat_nchw = jax.random.normal(k_feat1, (4, C, H, W), jnp.float32)
    _check(jnp.transpose(feat_nchw, (0, 2, 3, 1)), params, NUM_CLASSES)

    # Case 2: larger batch (B=64) -> larger auto-picked tile, no padding.
    feat_nchw = jax.random.normal(k_feat2, (64, C, H, W), jnp.float32)
    _check(jnp.transpose(feat_nchw, (0, 2, 3, 1)), params, NUM_CLASSES)

    print("KERNEL_OK")
</pallas_src>

<mosaic_0001>
module attributes {stable_mosaic.version = 11 : i64} {
  func.func @_pcb_part_kernel(%arg0: i32, %arg1: i32, %arg2: memref<8x2x4x32xbf16, #tpu.memory_space<vmem>>, %arg3: memref<1x32x32xbf16, #tpu.memory_space<vmem>>, %arg4: memref<1x1x32xf32, #tpu.memory_space<vmem>>, %arg5: memref<1x32x128xbf16, #tpu.memory_space<vmem>>, %arg6: memref<1x1x128xf32, #tpu.memory_space<vmem>>, %arg7: memref<1x8x128xf32, #tpu.memory_space<vmem>>) attributes {dimension_semantics = [#tpu.dimension_semantics<parallel>, #tpu.dimension_semantics<parallel>], iteration_bounds = array<i64: 6, 1>, scalar_prefetch = 0 : i64, scratch_operands = 0 : i64, tpu.core_type = #tpu.core_type<tc>, window_params = [{transform_indices = @transform_0, window_bounds = array<i64: 8, 2, 4, 32>}, {transform_indices = @transform_1, window_bounds = array<i64: 1, 32, 32>}, {transform_indices = @transform_2, window_bounds = array<i64: 1, 1, 32>}, {transform_indices = @transform_3, window_bounds = array<i64: 1, 32, 128>}, {transform_indices = @transform_4, window_bounds = array<i64: 1, 1, 128>}, {transform_indices = @transform_5, window_bounds = array<i64: 1, 8, 128>}]} {
    %c0 = arith.constant 0 : index
    %c0_0 = arith.constant 0 : index
    %c0_1 = arith.constant 0 : index
    %c0_2 = arith.constant 0 : index
    %0 = vector.load %arg2[%c0, %c0_0, %c0_1, %c0_2] : memref<8x2x4x32xbf16, #tpu.memory_space<vmem>>, vector<8x2x4x32xbf16>
    %1 = vector.shape_cast %0 : vector<8x2x4x32xbf16> to vector<8x8x32xbf16>
    %2 = arith.extf %1 : vector<8x8x32xbf16> to vector<8x8x32xf32>
    %cst = arith.constant dense<0.000000e+00> : vector<8x32xf32>
    %3 = vector.multi_reduction <add>, %2, %cst [1] : vector<8x8x32xf32> to vector<8x32xf32>
    %4 = arith.truncf %3 : vector<8x32xf32> to vector<8x32xbf16>
    %c0_3 = arith.constant 0 : index
    %c0_4 = arith.constant 0 : index
    %c0_5 = arith.constant 0 : index
    %5 = vector.load %arg3[%c0_3, %c0_4, %c0_5] : memref<1x32x32xbf16, #tpu.memory_space<vmem>>, vector<1x32x32xbf16>
    %6 = vector.shape_cast %5 : vector<1x32x32xbf16> to vector<32x32xbf16>
    %cst_6 = arith.constant dense<0.000000e+00> : vector<8x32xf32>
    %7 = tpu.matmul %4, %6, %cst_6 {dimension_numbers = #tpu.dot_dimension_numbers<[1], [0], [0], [1], [0, 0, 1, 1], [], []>} : vector<8x32xbf16>, vector<32x32xbf16>, vector<8x32xf32> -> vector<8x32xf32>
    %c0_7 = arith.constant 0 : index
    %c0_8 = arith.constant 0 : index
    %c0_9 = arith.constant 0 : index
    %8 = vector.load %arg4[%c0_7, %c0_8, %c0_9] : memref<1x1x32xf32, #tpu.memory_space<vmem>>, vector<1x1x32xf32>
    %9 = vector.shape_cast %8 : vector<1x1x32xf32> to vector<1x32xf32>
    %10 = vector.broadcast %9 : vector<1x32xf32> to vector<8x32xf32>
    %11 = arith.addf %7, %10 : vector<8x32xf32>
    %12 = arith.truncf %11 : vector<8x32xf32> to vector<8x32xbf16>
    %c0_10 = arith.constant 0 : index
    %c0_11 = arith.constant 0 : index
    %c0_12 = arith.constant 0 : index
    %13 = vector.load %arg5[%c0_10, %c0_11, %c0_12] : memref<1x32x128xbf16, #tpu.memory_space<vmem>>, vector<1x32x128xbf16>
    %14 = vector.shape_cast %13 : vector<1x32x128xbf16> to vector<32x128xbf16>
    %cst_13 = arith.constant dense<0.000000e+00> : vector<8x128xf32>
    %15 = tpu.matmul %12, %14, %cst_13 {dimension_numbers = #tpu.dot_dimension_numbers<[1], [0], [0], [1], [0, 0, 1, 1], [], []>} : vector<8x32xbf16>, vector<32x128xbf16>, vector<8x128xf32> -> vector<8x128xf32>
    %c0_14 = arith.constant 0 : index
    %c0_15 = arith.constant 0 : index
    %c0_16 = arith.constant 0 : index
    %16 = vector.load %arg6[%c0_14, %c0_15, %c0_16] : memref<1x1x128xf32, #tpu.memory_space<vmem>>, vector<1x1x128xf32>
    %17 = vector.shape_cast %16 : vector<1x1x128xf32> to vector<1x128xf32>
    %18 = vector.broadcast %17 : vector<1x128xf32> to vector<8x128xf32>
    %19 = arith.addf %15, %18 : vector<8x128xf32>
    %c0_17 = arith.constant 0 : index
    %c0_18 = arith.constant 0 : index
    %c0_19 = arith.constant 0 : index
    %20 = vector.load %arg7[%c0_17, %c0_18, %c0_19] : memref<1x8x128xf32, #tpu.memory_space<vmem>>, vector<1x8x128xf32>
    %21 = vector.shape_cast %20 : vector<1x8x128xf32> to vector<8x128xf32>
    %22 = vector.shape_cast %19 : vector<8x128xf32> to vector<1x8x128xf32>
    tpu.vector_store %arg7[%c0_17, %c0_18, %c0_19], %22 {strides = array<i32>} : memref<1x8x128xf32, #tpu.memory_space<vmem>>, vector<1x8x128xf32>,
    return
  }
  func.func @transform_0(%arg0: i32, %arg1: i32) -> (i32, i32, i32, i32) {
    %c0_i32 = arith.constant 0 : i32
    %c0_i32_0 = arith.constant 0 : i32
    %c0_i32_1 = arith.constant 0 : i32
    return %arg1, %arg0, %c0_i32, %c0_i32_0 : i32, i32, i32, i32
  }
  func.func @transform_1(%arg0: i32, %arg1: i32) -> (i32, i32, i32) {
    %c0_i32 = arith.constant 0 : i32
    %c0_i32_0 = arith.constant 0 : i32
    %c0_i32_1 = arith.constant 0 : i32
    return %arg0, %c0_i32, %c0_i32_0 : i32, i32, i32
  }
  func.func @transform_2(%arg0: i32, %arg1: i32) -> (i32, i32, i32) {
    %c0_i32 = arith.constant 0 : i32
    %c0_i32_0 = arith.constant 0 : i32
    %c0_i32_1 = arith.constant 0 : i32
    return %arg0, %c0_i32, %c0_i32_0 : i32, i32, i32
  }
  func.func @transform_3(%arg0: i32, %arg1: i32) -> (i32, i32, i32) {
    %c0_i32 = arith.constant 0 : i32
    %c0_i32_0 = arith.constant 0 : i32
    %c0_i32_1 = arith.constant 0 : i32
    return %arg0, %c0_i32, %c0_i32_0 : i32, i32, i32
  }
  func.func @transform_4(%arg0: i32, %arg1: i32) -> (i32, i32, i32) {
    %c0_i32 = arith.constant 0 : i32
    %c0_i32_0 = arith.constant 0 : i32
    %c0_i32_1 = arith.constant 0 : i32
    return %arg0, %c0_i32, %c0_i32_0 : i32, i32, i32
  }
  func.func @transform_5(%arg0: i32, %arg1: i32) -> (i32, i32, i32) {
    %c0_i32 = arith.constant 0 : i32
    %c0_i32_0 = arith.constant 0 : i32
    return %arg0, %arg1, %c0_i32 : i32, i32, i32
  }
}

</mosaic_0001>

<bundles_post_ra>
// kernel: tpu_custom_call.1
= control target key start
LH: loop header
LB: loop body
LE: loop exit
PB: predicated region body
PF: predicated region fallthrough
CT: control target
= control target key end

     0   :  { %s1461_s0 = inlined_call_operand.hbm [shape: bf16[8,12,4,32], index: 0, kind: input, shape index: {}]   ;;  %s1462_s1 = inlined_call_operand.hbm [shape: bf16[6,32,32], index: 1, kind: input, shape index: {}]   ;;  %s1463_s2 = inlined_call_operand.hbm [shape: f32[6,1,32], index: 2, kind: input, shape index: {}]   ;;  %s1464_s3 = inlined_call_operand.hbm [shape: bf16[6,32,128], index: 3, kind: input, shape index: {}]   ;;  %s1465_s4 = inlined_call_operand.hbm [shape: f32[6,1,128], index: 4, kind: input, shape index: {}]   ;;  %s1466_s5 = inlined_call_operand.hbm [shape: f32[6,8,128], index: 5, kind: output, shape index: {}]  }
   0x1   :  { %1473 = sst [smem:[#allocation25_spill]] %s1461_s0 }
   0x2   :  { %1474 = sst [smem:[#allocation26_spill]] %s1462_s1 }
   0x3   :  { %10 = vsyncpa [#allocation3], 0 }
   0x4   :  { %12 = vsyncpa [#allocation3 + $0x1], 0 }
   0x5   :  { %13 = vsyncpa [#allocation6], 0 }
   0x6   :  { %15 = vsyncpa [#allocation6 + $0x1], 0 }
   0x7   :  { %16 = vsyncpa [#allocation9], 0 }
   0x8   :  { %18 = vsyncpa [#allocation9 + $0x1], 0 }
   0x9   :  { %19 = vsyncpa [#allocation4], 0 }
   0xa   :  { %21 = vsyncpa [#allocation4 + $0x1], 0  ;;  %s1245_s18 = smov 0   ;;  %s1247_s19 = smov 0  }
   0xb   :  { %s1249_s20 = smov 0   ;;  %s1251_s21 = smov 0  }
   0xc   :  { %s1253_s22 = smov 0   ;;  %s1255_s23 = smov 0  }
   0xd LB: > { %1475 = sst [smem:[#allocation19_spill]] %s1186_s18  ;;  %s1276_s24 = sadd.s32 4294967295, %s1206_s23   ;;  %s1206_s23 = sphi %s1255_s23, %s27_s23   ;;  %s1202_s22 = sphi %s1253_s22, %s1497_s22   ;;  %s1198_s21 = sphi %s1251_s21, %s1496_s21   ;;  %s1194_s20 = sphi %s1249_s20, %s1495_s20   ;;  %s1190_s19 = sphi %s1247_s19, %s1494_s19   ;;  %s1186_s18 = sphi %s1245_s18, %s1493_s18  }
   0xe   : > { %1476 = sst [smem:[#allocation20_spill]] %s1194_s20  ;;  %s875_s25 = sadd.s32 4294967294, %s1206_s23  }
   0xf   : > { %s39_s26 = sadd.s32 1, %s1202_s22  ;;  %s48_s27 = sadd.s32 1, %s1194_s20 }
  0x10   : > { %p41_p0 = scmp.ge.s32.totalorder %s39_s26, 6  ;;  %p55_p1 = scmp.ne.s32.totalorder %s1194_s20, %s1190_s19 }
  0x11   : > { %p56_p2 = scmp.eq.s32.totalorder %s1206_s23, 0  ;;  %p61_p3 = scmp.ne.s32.totalorder %s1190_s19, %s1186_s18 }
  0x12   : > { %s1499_s26 = smov (%p41_p0, %s39_s26), 0  ;;  %p62_p5 = scmp.eq.s32.totalorder %s1276_s24, 0 }
  0x13   : > { %1477 = sst [smem:[#allocation21_spill]] %s1499_s26  ;;  %p1288_p4 = por %p56_p2, %p55_p1 }
  0x14   : > { %s44_s29 = ssub.s32 %s1202_s22, %s1499_s26  ;;  %p191_p6 = scmp.eq.s32.totalorder %s1276_s24, 5 }
  0x15   : > { %p46_p7 = scmp.eq.s32.totalorder %s44_s29, 0  ;;  %p1296_p8 = por %p62_p5, %p61_p3 }
  0x16   : > { %p1300_p9 = por %p191_p6, %p55_p1  ;;  %p197_p10 = scmp.eq.s32.totalorder %s875_s25, 5 }
  0x17   : > { %s1305_s7 = scalar_select %p46_p7, %s1194_s20, %s48_s27  }
  0x18   : > { %s1480_s6 = scalar_select %p1300_p9, 1, 0 }
  0x19   : > { %1482 = sst [smem:[#allocation23_spill]] %s1305_s7  ;;  %p1307_p11 = por %p197_p10, %p61_p3 }
  0x1a   : > { %1481 = sst [smem:[#allocation22_spill]] %s1480_s6  ;;  %p877_p12 = scmp.ge.s32.totalorder %s1206_s23, 6 }
  0x1b   : > { %s1483_s8 = scalar_select %p1307_p11, 1, 0 }
  0x1c   : > { %213 = sbr.rel (%p877_p12) target bundleno = 63 (0x3f), region = 16 }
  0x1d   : > { %1484 = sst [smem:[#allocation24_spill]] %s1483_s8 }
  0x21   : > { %s1313_s9 = sand.u32 1, %s1194_s20   ;;  %s916_s10 = sshll.u32 %s1202_s22, 2 }
  0x22   : > { %s878_s11 = sshll.u32 %s1313_s9, 5  ;;  %s1485_s0 = sld [smem:[#allocation25_spill]] }
  0x23   : > { %s923_s15 = scalar_select %p1288_p4, [#allocation0], [#allocation14] }
  0x24   : > { %s221_s17 = scalar_lea.vmem [#allocation2], %s878_s11  ;;  %s1208_s29 = smov 384  }
  0x25   : > { %s244_s25 = sshll.u32 %s221_s17, 4  ;;  %s234_s27 = sld [smem:[%s923_s15]]   ;;  %s245_s25 = int_to_ptr.vmem [resolvable:$true] %s244_s25 }
  0x26   : > { %924 = sst [smem:[#allocation13]] (%p1288_p4), %s1208_s29  ;;  %s1209_s26 = smov 64  }
  0x27   : > { %925 = sst [smem:[#allocation13 + $0x1]] (%p1288_p4), %s1209_s26  ;;  %s1210_s12 = smov 2  }
  0x28   : > { %s229_s14 = scalar_lea.hbm %s1485_s0, %s916_s10  ;;  %926 = sst [smem:[#allocation13 + $0x2]] (%p1288_p4), %s1210_s12 }
  0x29   : > { %s242_s16 = sshll.u32 %s229_s14, 4  ;;  %s1211_s10 = smov 32   ;;  %s243_s16 = int_to_ptr.hbm [resolvable:$true] %s242_s16 }
  0x2a   : > { %927 = sst [smem:[#allocation13 + $0x3]] (%p1288_p4), %s1211_s10  ;;  %s218_s14 = scalar_lea.sflag [#allocation3], %s1313_s9 }
  0x2b   : > { %s881_s11 = sshll.u32 %s234_s27, 26  ;;  %928 = sst [smem:[#allocation13 + $0x4]] (%p1288_p4), %s1211_s10 }
  0x2c   : > { %s882_s13 = sadd.s32 134217728, %s881_s11  ;;  %929 = sst [smem:[#allocation13 + $0x5]] (%p1288_p4), %s1210_s12 }
  0x2d   : > { %s1212_s15 = smov [#allocation12]   ;;  %s267_s26 = sand.u32 1, %s1206_s23  }
  0x2e   : > { %930 = dma.general (%p1288_p4), %s243_s16, 512, %s245_s25, %s218_s14, %s1212_s15, [#allocation13], %s882_s13, 0  }
  0x2f   : > { %s883_s17 = sshll.u32 %s1313_s9, 4  ;;  %s917_s29 = sshll.u32 %s1202_s22, 4 }
  0x30   : > { %s271_s0 = scalar_lea.vmem [#allocation5], %s883_s17  ;;  %s1486_s1 = sld [smem:[#allocation26_spill]] }
  0x31   : > { %s279_s7 = sshll.u32 %s271_s0, 4  ;;  %s268_s16 = scalar_lea.sflag [#allocation6], %s267_s26  ;;  %s280_s7 = int_to_ptr.vmem [resolvable:$true] %s279_s7 }
  0x32   : > { %s1213_s25 = smov 64   ;;  %s1214_s11 = smov 4  }
  0x33   : > { %s315_s0 = scalar_lea.hbm %s1464_s3, %s917_s29  ;;  %s310_s20 = scalar_lea.vmem [#allocation8], %s883_s17 }
  0x34   : > { %s318_s15 = sshll.u32 %s310_s20, 4  ;;  %s316_s27 = sshll.u32 %s315_s0, 4  ;;  %s319_s15 = int_to_ptr.vmem [resolvable:$true] %s318_s15  ;;  %s317_s27 = int_to_ptr.hbm [resolvable:$true] %s316_s27 }
  0x35   : > { %s295_s18 = scalar_lea.hbm %s1463_s2, %s1202_s22  ;;  %s334_s13 = scalar_lea.hbm %s1465_s4, %s1202_s22 }
  0x36   : > { %s276_s10 = scalar_lea.hbm %s1486_s1, %s917_s29  ;;  %s297_s6 = sshll.u32 %s295_s18, 4  ;;  %s298_s6 = int_to_ptr.hbm [resolvable:$true] %s297_s6 }
  0x37   : > { %s277_s12 = sshll.u32 %s276_s10, 4  ;;  %s307_s10 = scalar_lea.sflag [#allocation9], %s267_s26  ;;  %s278_s12 = int_to_ptr.hbm [resolvable:$true] %s277_s12 }
  0x38   : > { %931 = dma.hbm_to_vmem [thread:$0]  (%p1288_p4), %s278_s12, 256, %s280_s7, %s268_s16, %s1213_s25, %s1213_s25, %s1214_s11  }
  0x39   : > { %933 = dma.hbm_to_vmem [thread:$0]  (%p1288_p4), %s317_s27, 256, %s319_s15, %s307_s10, %s1213_s25, %s1213_s25, %s1214_s11  }
  0x3a   : > { %s292_s7 = scalar_lea.vmem [#allocation7], %s1313_s9  ;;  %s331_s14 = scalar_lea.vmem [#allocation10], %s1313_s9 }
  0x3b   : > { %s299_s12 = sshll.u32 %s292_s7, 4  ;;  %s338_s0 = sshll.u32 %s331_s14, 4  ;;  %s300_s12 = int_to_ptr.vmem [resolvable:$true] %s299_s12  ;;  %s339_s0 = int_to_ptr.vmem [resolvable:$true] %s338_s0 }
  0x3c   : > { %932 = dma.hbm_to_vmem [thread:$0]  (%p1288_p4), %s298_s6, 16, %s300_s12, %s268_s16  }
  0x3d   : > { %s336_s26 = sshll.u32 %s334_s13, 4  ;;  %s337_s26 = int_to_ptr.hbm [resolvable:$true] %s336_s26 }
  0x3e   : > { %934 = dma.hbm_to_vmem [thread:$0]  (%p1288_p4), %s337_s26, 16, %s339_s0, %s307_s10  }
  0x3f PF: > { %p889_p13 = scmp.ge.s32.totalorder %s1206_s23, 1  ;;  %p343_p0 = scmp.lt.s32.totalorder %s1206_s23, 7 }
  0x41   : > { %p344_p1 = pnand %p889_p13, %p343_p0 }
  0x42   : > { %s1367_s1 = sand.u32 (!%p344_p1), 1, %s1190_s19  }
  0x43   : > { %347 = sbr.rel (%p344_p1) target bundleno = 391 (0x187), region = 40  ;;  %s890_s18 = sshll.u32 (!%p344_p1), %s1367_s1, 5 }
  0x44   : > { %s350_s6 = scalar_lea.sflag (!%p344_p1), [#allocation3], %s1367_s1  ;;  %s1371_s8 = scalar_lea.vmem (!%p344_p1), [#allocation2], %s890_s18 }
  0x48   : > { %1169 = dma.done.wait (%p1296_p8), %s350_s6, 512  }
  0x49   : > { %1171 = vsyncadd (%p1296_p8), %s350_s6, 4294966784  ;;  %s359_s28 = sand.u32 1, %s1276_s24   ;;  %s891_s9 = sshll.u32 %s1367_s1, 4 }
  0x4a   : > { %s360_s16 = scalar_lea.sflag [#allocation6], %s359_s28  ;;  %s363_s25 = scalar_lea.vmem [#allocation5], %s891_s9 }
  0x4b   : > { %1173 = dma.done.wait (%p1296_p8), %s360_s16, 272  }
  0x4c   : > { %1175 = vsyncadd (%p1296_p8), %s360_s16, 4294967024  ;;  %s372_s11 = scalar_lea.vmem [#allocation7], %s1367_s1  ;;  %s379_s20 = scalar_lea.sflag [#allocation9], %s359_s28 }
  0x4d   : > { %s1384_s15 = scalar_lea.vmem [#allocation8], %s891_s9 }
  0x4e   : > { %1177 = dma.done.wait (%p1296_p8), %s379_s20, 272  }
  0x4f   : > { %1179 = vsyncadd (%p1296_p8), %s379_s20, 4294967024  ;;  %v920_v0 = vld [vmem:[%s363_s25 + $0x8] sm:$0xff]  ;;  %v440_v1 = vld [vmem:[%s1371_s8] sm:$0x3]  ;;  %vm527_vm0 = vcmask 261120   ;;  %vm616_vm1 = vcmask 1041409  }
  0x50   : > { %v441_v2 = vld [vmem:[%s1371_s8 + $0x2] sm:$0x3]  ;;  %v442_v3 = vld [vmem:[%s1371_s8 + $0x4] sm:$0x3]  ;;  %652 = vmatpush.bf16.msra.mxu0 %v920_v0  ;;  %v443_v5 = vld [vmem:[%s1371_s8 + $0x6] sm:$0x3]  ;;  %v456_v6 = vunpack.c.l.bf16 %v440_v1 }
  0x51   : > { %v919_v4 = vld [vmem:[%s363_s25] sm:$0xff]  ;;  %v444_v7 = vld [vmem:[%s1371_s8 + $0x8] sm:$0x3]  ;;  %v457_v8 = vunpack.c.l.bf16 %v441_v2  ;;  %v445_v9 = vld [vmem:[%s1371_s8 + $0xa] sm:$0x3]  ;;  %v458_v10 = vunpack.c.l.bf16 %v442_v3  ;;  %v459_v12 = vunpack.c.l.bf16 %v443_v5  ;;  %vm618_vm2 = vcmask 1042434  }
  0x52   : > { %v446_v11 = vld [vmem:[%s1371_s8 + $0xc] sm:$0x3]  ;;  %v447_v13 = vld [vmem:[%s1371_s8 + $0xe] sm:$0x3]  ;;  %v460_v14 = vunpack.c.l.bf16 %v444_v7  ;;  %488 = vst [vmem:[#allocation1] ss:$2 sm:$0xff] %v456_v6  ;;  %v461_v15 = vunpack.c.l.bf16 %v445_v9 }
  0x53   : > { %490 = vst [vmem:[#allocation1 + $0x1] ss:$2 sm:$0xff] %v457_v8  ;;  %v448_v16 = vld [vmem:[%s1371_s8 + $0x10] sm:$0x3]  ;;  %v462_v17 = vunpack.c.l.bf16 %v446_v11  ;;  %v449_v18 = vld [vmem:[%s1371_s8 + $0x12] sm:$0x3]  ;;  %v463_v19 = vunpack.c.l.bf16 %v447_v13 }
  0x54   : > { %653 = vmatpush.bf16.msra.mxu0 %v919_v4  ;;  %493 = vst [vmem:[#allocation1 + $0x10] ss:$2 sm:$0xff] %v458_v10  ;;  %v450_v20 = vld [vmem:[%s1371_s8 + $0x14] sm:$0x3]  ;;  %v451_v21 = vld [vmem:[%s1371_s8 + $0x16] sm:$0x3]  ;;  %v464_v22 = vunpack.c.l.bf16 %v448_v16  ;;  %v465_v24 = vunpack.c.l.bf16 %v449_v18 }
  0x55   : > { %495 = vst [vmem:[#allocation1 + $0x11] ss:$2 sm:$0xff] %v459_v12  ;;  %v452_v23 = vld [vmem:[%s1371_s8 + $0x18] sm:$0x3]  ;;  %v453_v25 = vld [vmem:[%s1371_s8 + $0x1a] sm:$0x3]  ;;  %v466_v26 = vunpack.c.l.bf16 %v450_v20  ;;  %v467_v28 = vunpack.c.l.bf16 %v451_v21 }
  0x56   : > { %498 = vst [vmem:[#allocation1 + $0x20] ss:$2 sm:$0xff] %v460_v14  ;;  %v454_v27 = vld [vmem:[%s1371_s8 + $0x1c] sm:$0x3]  ;;  %v455_v30 = vld [vmem:[%s1371_s8 + $0x1e] sm:$0x3]  ;;  %v468_v31 = vunpack.c.l.bf16 %v452_v23  ;;  %v469_v33 = vunpack.c.l.bf16 %v453_v25 }
  0x57   : > { %500 = vst [vmem:[#allocation1 + $0x21] ss:$2 sm:$0xff] %v461_v15  ;;  %v470_v36 = vunpack.c.l.bf16 %v454_v27  ;;  %v471_v38 = vunpack.c.l.bf16 %v455_v30  ;;  %v922_v43 = vld [vmem:[%s1384_s15 + $0x8] sm:$0xff]  ;;  %vm620_vm3 = vcmask 1043459   ;;  %vm622_vm4 = vcmask 1044484   ;;  %s391_s24 = scalar_lea.vmem [#allocation10], %s1367_s1 }
  0x58   : > { %503 = vst [vmem:[#allocation1 + $0x30] ss:$2 sm:$0xff] %v462_v17  ;;  %689 = vmatpush.bf16.msra.mxu1 %v922_v43  ;;  %vm624_vm5 = vcmask 1045509   ;;  %vm626_vm6 = vcmask 1046534   ;;  %vm628_vm7 = vcmask 1047559   ;;  %s913_s30 = sshll.u32 %s1198_s21, 3 }
  0x59   : > { %505 = vst [vmem:[#allocation1 + $0x31] ss:$2 sm:$0xff] %v463_v19  ;;  %s893_s27 = sshll.u32 %s1367_s1, 3  ;;  %s709_s17 = scalar_lea.hbm %s1466_s5, %s913_s30 }
  0x5a   : > { %v491_v29 = vld.sshfl [vmem:[#allocation1] sm:$0xff pattern:$0x75316420]  ;;  %s436_s29 = scalar_lea.vmem [#allocation11], %s893_s27  ;;  %s713_s14 = sshll.u32 %s709_s17, 4  ;;  %s714_s14 = int_to_ptr.hbm [resolvable:$true] %s713_s14 }
  0x5b   : > { %507 = vst [vmem:[#allocation1] ss:$2 sm:$0xff] %v464_v22  ;;  %v528_v32 = vsel %vm527_vm0, %v491_v29, 0.0  ;;  %s711_s13 = sshll.u32 %s436_s29, 4  ;;  %s698_s0 = scalar_lea.sflag [#allocation4], %s1367_s1  ;;  %s712_s13 = int_to_ptr.vmem [resolvable:$true] %s711_s13 }
  0x5c   : > { %v496_v34 = vld.sshfl [vmem:[#allocation1 + $0x10] sm:$0xff pattern:$0x75316420]  ;;  %508 = vst [vmem:[#allocation1 + $0x1] ss:$2 sm:$0xff] %v465_v24  ;;  %v529_v35 = vrot.slane %v528_v32, 4 }
  0x5d   : > { %510 = vst [vmem:[#allocation1 + $0x10] ss:$2 sm:$0xff] %v466_v26  ;;  %v535_v37 = vsel %vm527_vm0, %v496_v34, 0.0  ;;  %s1130_s26 = sshra.s32 %s714_s14, 4  ;;  %s1136_s8 = scalar_lea.hbm %s1466_s5, 48  ;;  %s1131_s26 = int_to_ptr.hbm [resolvable:$true] %s1130_s26 }
  0x5e   : > { %v501_v39 = vld.sshfl [vmem:[#allocation1 + $0x20] sm:$0xff pattern:$0x75316420]  ;;  %511 = vst [vmem:[#allocation1 + $0x11] ss:$2 sm:$0xff] %v467_v28  ;;  %v530_v40 = vadd.f32 %v529_v35, %v528_v32  ;;  %v536_v41 = vrot.slane %v535_v37, 4  ;;  %p1137_p5 = scmp.lt.s32.totalorder %s1131_s26, %s1466_s5 }
  0x5f   : > { %513 = vst [vmem:[#allocation1 + $0x20] ss:$2 sm:$0xff] %v468_v31  ;;  %v542_v42 = vsel %vm527_vm0, %v501_v39, 0.0  ;;  %s1132_s18 = scalar_lea.hbm %s1131_s26, 8 }
  0x60   : > { %v506_v44 = vld.sshfl [vmem:[#allocation1 + $0x30] sm:$0xff pattern:$0x75316420]  ;;  %514 = vst [vmem:[#allocation1 + $0x21] ss:$2 sm:$0xff] %v469_v33  ;;  %v531_v45 = vrot.slane %v530_v40, 2  ;;  %v537_v46 = vadd.f32 %v536_v41, %v535_v37  ;;  %p1133_p2 = scmp.ne.s32.totalorder %s1131_s26, %s1132_s18  ;;  %p1138_p6 = scmp.lt.s32.totalorder %s1136_s8, %s1132_s18 }
  0x61   : > { %516 = vst [vmem:[#allocation1 + $0x30] ss:$2 sm:$0xff] %v470_v36  ;;  %v543_v47 = vrot.slane %v542_v42, 4  ;;  %v549_v48 = vsel %vm527_vm0, %v506_v44, 0.0 }
  0x62   : > { %517 = vst [vmem:[#allocation1 + $0x31] ss:$2 sm:$0xff] %v471_v38  ;;  %v532_v49 = vadd.f32 %v531_v45, %v530_v40  ;;  %v538_v50 = vrot.slane %v537_v46, 2  ;;  %v550_v51 = vrot.slane %v549_v48, 4  ;;  %p1134_p3 = pnand %p1133_p2, %p1300_p9  ;;  %p1139_p7 = por %p1138_p6, %p1137_p5 }
  0x63   : > { %v509_v52 = vld.sshfl [vmem:[#allocation1] sm:$0xff pattern:$0x75316420]  ;;  %v544_v53 = vadd.f32 %v543_v47, %v542_v42 }
  0x64   : > { %v533_v54 = vrot.slane %v532_v49, 1  ;;  %v539_v55 = vadd.f32 %v538_v50, %v537_v46  ;;  %v551_v56 = vadd.f32 %v550_v51, %v549_v48  ;;  %v556_v57 = vsel %vm527_vm0, %v509_v52, 0.0  ;;  %p1135_p4 = pneg %p1134_p3 }
  0x65   : > { %v512_v58 = vld.sshfl [vmem:[#allocation1 + $0x10] sm:$0xff pattern:$0x75316420]  ;;  %v545_v59 = vrot.slane %v544_v53, 2  ;;  %v557_v60 = vrot.slane %v556_v57, 4 }
  0x66   : > { %v534_v61 = vadd.f32 %v533_v54, %v532_v49  ;;  %v540_v62 = vrot.slane %v539_v55, 1  ;;  %v552_v63 = vrot.slane %v551_v56, 2  ;;  %v563_v0 = vsel %vm527_vm0, %v512_v58, 0.0  ;;  %p1140_p8 = pnand %p1139_p7, %p1135_p4 }
  0x67   : > { %v515_v1 = vld.sshfl [vmem:[#allocation1 + $0x20] sm:$0xff pattern:$0x75316420]  ;;  %v546_v2 = vadd.f32 %v545_v59, %v544_v53  ;;  %v558_v3 = vadd.f32 %v557_v60, %v556_v57  ;;  %v564_v4 = vrot.slane %v563_v0, 4 }
  0x68   : > { %v541_v5 = vadd.f32 %v540_v62, %v539_v55  ;;  %v553_v6 = vadd.f32 %v552_v63, %v551_v56  ;;  %v570_v7 = vsel %vm527_vm0, %v515_v1, 0.0  ;;  %v584_v8 = vpack.c.bf16 %v534_v61, %v534_v61  ;;  %v921_v59 = vld [vmem:[%s1384_s15] sm:$0xff] }
  0x69   : > { %v518_v9 = vld.sshfl [vmem:[#allocation1 + $0x30] sm:$0xff pattern:$0x75316420]  ;;  %v547_v10 = vrot.slane %v546_v2, 1  ;;  %v559_v11 = vrot.slane %v558_v3, 2  ;;  %v565_v12 = vadd.f32 %v564_v4, %v563_v0  ;;  %v571_v13 = vrot.slane %v570_v7, 4  ;;  %690 = vmatpush.bf16.msra.mxu1 %v921_v59 }
  0x6a   : > { %v554_v14 = vrot.slane %v553_v6, 1  ;;  %v577_v15 = vsel %vm527_vm0, %v518_v9, 0.0  ;;  %v585_v16 = vpack.c.bf16 %v541_v5, %v541_v5  ;;  %v608_v17 = vunpack.c.l.b16 %v584_v8  ;;  %v1002_v60 = vld [vmem:[%s372_s11] ss:$0 sm:$0xff] }
  0x6b   : > { %v548_v18 = vadd.f32 %v547_v10, %v546_v2  ;;  %v560_v19 = vadd.f32 %v559_v11, %v558_v3  ;;  %v566_v20 = vrot.slane %v565_v12, 2  ;;  %v572_v21 = vadd.f32 %v571_v13, %v570_v7  ;;  %v1003_v1 = vld [vmem:[%s391_s24] ss:$0 sm:$0xff] }
  0x6c   : > { %v555_v22 = vadd.f32 %v554_v14, %v553_v6  ;;  %v578_v23 = vrot.slane %v577_v15, 4  ;;  %v609_v24 = vunpack.c.l.b16 %v585_v16 }
  0x6d   : > { %v561_v25 = vrot.slane %v560_v19, 1  ;;  %v567_v26 = vadd.f32 %v566_v20, %v565_v12  ;;  %v573_v27 = vrot.slane %v572_v21, 2  ;;  %v586_v28 = vpack.c.bf16 %v548_v18, %v548_v18 }
  0x6e   : > { %v579_v29 = vadd.f32 %v578_v23, %v577_v15  ;;  %v587_v30 = vpack.c.bf16 %v555_v22, %v555_v22  ;;  %v617_v31 = vsel %vm616_vm1, %v609_v24, %v608_v17 }
  0x6f   : > { %v562_v32 = vadd.f32 %v561_v25, %v560_v19  ;;  %v568_v33 = vrot.slane %v567_v26, 1  ;;  %v574_v34 = vadd.f32 %v573_v27, %v572_v21  ;;  %v610_v35 = vunpack.c.l.b16 %v586_v28 }
  0x70   : > { %v580_v36 = vrot.slane %v579_v29, 2  ;;  %v611_v37 = vunpack.c.l.b16 %v587_v30 }
  0x71   : > { %v569_v38 = vadd.f32 %v568_v33, %v567_v26  ;;  %v575_v39 = vrot.slane %v574_v34, 1  ;;  %v588_v40 = vpack.c.bf16 %v562_v32, %v562_v32  ;;  %v619_v41 = vsel %vm618_vm2, %v610_v35, %v617_v31 }
  0x72   : > { %v581_v42 = vadd.f32 %v580_v36, %v579_v29  ;;  %v621_v43 = vsel %vm620_vm3, %v611_v37, %v619_v41 }
  0x73   : > { %v576_v44 = vadd.f32 %v575_v39, %v574_v34  ;;  %v589_v45 = vpack.c.bf16 %v569_v38, %v569_v38  ;;  %v612_v46 = vunpack.c.l.b16 %v588_v40 }
  0x74   : > { %v582_v47 = vrot.slane %v581_v42, 1 }
  0x75   : > { %v590_v48 = vpack.c.bf16 %v576_v44, %v576_v44  ;;  %v613_v49 = vunpack.c.l.b16 %v589_v45  ;;  %v623_v50 = vsel %vm622_vm4, %v612_v46, %v621_v43 }
  0x76   : > { %v583_v51 = vadd.f32 %v582_v47, %v581_v42 }
  0x77   : > { %v614_v52 = vunpack.c.l.b16 %v590_v48  ;;  %v625_v53 = vsel %vm624_vm5, %v613_v49, %v623_v50 }
  0x78   : > { %v591_v54 = vpack.c.bf16 %v583_v51, %v583_v51 }
  0x79   : > { %v627_v55 = vsel %vm626_vm6, %v614_v52, %v625_v53 }
  0x7a   : > { %v615_v56 = vunpack.c.l.b16 %v591_v54 }
  0x7c   : > { %v629_v57 = vsel %vm628_vm7, %v615_v56, %v627_v55 }
  0x7d   : > { %v630_v58 = vpack.c.b16 %v629_v57, %v629_v57 }
  0x7f   : > { %902 = vmatmul.msk.bf16.vlgmr.msra.gmra.mxu0 %vm527_vm0, %v630_v58 }
  0xfc   : > { %v655_v61 = vpop.f32.mrf.mxu0 }
  0xfd   : > { %v656_v62 = vadd.f32 %v1002_v60, %v655_v61 }
  0xff   : > { %v659_v63 = vpack.c.bf16 %v656_v62, %v656_v62 }
 0x101   : > { %911 = vmatmul.msk.bf16.vlgmr.msra.gmra.mxu1 %vm527_vm0, %v659_v63 }
 0x104   : > { %v657_v0 = vpop.f32.mrf.mxu0 }
 0x17e   : > { %v692_v2 = vpop.f32.mrf.mxu1 }
 0x17f   : > { %v693_v3 = vadd.f32 %v1003_v1, %v692_v2 }
 0x181   : > { %696 = vst [vmem:[%s436_s29] sm:$0xff] %v693_v3 }
 0x182   : > { %1143 = shalt.err (!%p1140_p8)
}
 0x183   : > { %940 = dma.vmem_to_hbm [thread:$0]  (%p1300_p9), %s712_s13, 128, %s714_s14, %s698_s0  }
 0x186   : > { %v694_v4 = vpop.f32.mrf.mxu1 }
 0x187 PF: > { %s1488_s1 = sld [smem:[#allocation19_spill]]  ;;  %p946_p10 = scmp.ge.s32.totalorder %s1206_s23, 2 }
 0x189   : > { %p943_p12 = pnand %p946_p10, %p1307_p11 }
 0x18b   : > { %p944_p13 = pneg %p943_p12 }
 0x18d   : > { %s725_s25 = sand.u32 1, %s1488_s1  }
 0x18e   : > { %s726_s11 = scalar_lea.sflag [#allocation4], %s725_s25 }
 0x18f   : > { %1181 = dma.done.wait (%p944_p13), %s726_s11, 128  }
 0x190   : > { %1183 = vsyncadd (%p944_p13), %s726_s11, 4294967168  ;;  %s27_s23 = sadd.s32 1, %s1206_s23   ;;  %s1490_s20 = sld [smem:[#allocation20_spill]] }
 0x191   : > { %p24_p0 = scmp.ge.s32.totalorder %s27_s23, 8   ;;  %s1491_s15 = sld [smem:[#allocation23_spill]] }
 0x192   : > { %s1492_s24 = sld [smem:[#allocation21_spill]]  ;;  %s1493_s18 = smov %s1190_s19 }
 0x193   : > { %s1496_s21 = smov %s1202_s22 }
 0x194   :  { %26 = sbr.rel (!%p24_p0) target bundleno = 13 (0xd), region = 145 }
 0x196   : > { %s1494_s19 = smov %s1490_s20 }
 0x197   : > { %s1495_s20 = smov %s1491_s15 }
 0x198   : > { %s1497_s22 = smov %s1492_s24 }
 0x199   :  { %732 = vsyncpa [#allocation3], 1 }
 0x19a   :  { %734 = vsyncpa [#allocation3 + $0x1], 1 }
 0x19b   :  { %735 = vsyncpa [#allocation6], 1 }
 0x19c   :  { %737 = vsyncpa [#allocation6 + $0x1], 1 }
 0x19d   :  { %738 = vsyncpa [#allocation9], 1 }
 0x19e   :  { %740 = vsyncpa [#allocation9 + $0x1], 1 }
 0x19f   :  { %741 = vsyncpa [#allocation4], 1 }
 0x1a0   :  { %743 = vsyncpa [#allocation4 + $0x1], 1 }

</bundles_post_ra>
